<compile_context>
chip_gen: v6e
topology: v6e:2x2x1
jax: 0.10.0
libtpu: 0.0.40
codegen_flags: <defaults>
</compile_context>

<pallas_src>
import jax
import jax.numpy as jnp
from jax import lax
from jax.experimental import pallas as pl
from jax.experimental.pallas import tpu as pltpu


# ----------------------------- Pallas kernel ------------------------------ #

def birdclef_kernel(patches_ref, wconv_ref, bconv_ref, wcls_ref, bcls_ref,
                    logits_ref, acc_ref):
    """One (batch-tile, spatial-tile) step of the fused forward pass.

    patches_ref : (TB, TP, K)   bf16  im2col patches (K unpadded)
    wconv_ref   : (K, Fp)       bf16  conv weight as matmul (F zero-padded)
    bconv_ref   : (1, Fp)       f32   conv bias (zero-padded)
    wcls_ref    : (Fp, NCp)     bf16  classifier weight, pre-scaled by 1/P
    bcls_ref    : (1, NCp)      f32   classifier bias (padding correction folded in)
    logits_ref  : (TB, NCp)     f32   lane-dense output block
    acc_ref     : (TB, Fp)      f32   running pooled-sum accumulator (VMEM)
    """
    p_idx = pl.program_id(1)

    @pl.when(p_idx == 0)
    def _():
        acc_ref[...] = jnp.zeros_like(acc_ref)

    x = patches_ref[...]                                  # (TB, TP, K) bf16
    tb, tp, k = x.shape
    fp = wconv_ref.shape[1]

    # Backbone stand-in: conv-as-matmul, flattened 2-D MXU matmul with f32
    # accumulation, then bias + ReLU.
    feat = jnp.dot(x.reshape(tb * tp, k), wconv_ref[...],
                   preferred_element_type=jnp.float32)    # (TB*TP, Fp) f32
    feat = jnp.maximum(feat + bconv_ref[...], 0.0)

    # AdaptiveAvgPool2d(1): accumulate the per-batch spatial sum.  The 1/P
    # normalisation is folded into wcls; padded spatial rows (all-zero
    # patches -> exactly relu(b_conv)) are corrected via bcls in the wrapper.
    acc_ref[...] += feat.reshape(tb, tp, fp).sum(axis=1)

    @pl.when(p_idx == pl.num_programs(1) - 1)
    def _():
        logits = jnp.dot(acc_ref[...].astype(jnp.bfloat16), wcls_ref[...],
                         preferred_element_type=jnp.float32) + bcls_ref[...]
        logits_ref[...] = logits.astype(logits_ref.dtype)


# ------------------------------- JAX glue ---------------------------------- #

def _round_up(n, m):
    return (n + m - 1) // m * m


def _pick_tile_p(P, K, tile_b, patch_buf_bytes=4 << 20):
    """Spatial tile so one patch block is a large DMA but two in-flight buffers
    stay ~<= 8 MiB (safe on v5e's 16 MiB scoped-VMEM default; v6e/v7x could go
    larger with vmem_limit_bytes, but v7x physical VMEM is only 64 MiB)."""
    bytes_per_row = tile_b * K * 2            # bf16
    cap = max(8, patch_buf_bytes // bytes_per_row)
    cap = min(2048, (cap // 8) * 8)
    return max(8, min(_round_up(P, 8), cap))


def extract_patches_nhwc(x_nhwc, kh=3, kw=3, stride=2, pad=1):
    """im2col: (B,H,W,C) -> (B, OH*OW, kh*kw*C), tap order (i, j, c)."""
    B, H, W, C = x_nhwc.shape
    xp = jnp.pad(x_nhwc, ((0, 0), (pad, pad), (pad, pad), (0, 0)))
    OH = (H + 2 * pad - kh) // stride + 1
    OW = (W + 2 * pad - kw) // stride + 1
    cols = []
    for i in range(kh):
        for j in range(kw):
            cols.append(xp[:, i:i + stride * OH:stride,
                           j:j + stride * OW:stride, :])
    patches = jnp.concatenate(cols, axis=-1)              # (B, OH, OW, kh*kw*C)
    return patches.reshape(B, OH * OW, kh * kw * C), (OH, OW)


def birdclef_forward(x_nchw, w_conv_oihw, b_conv, w_cls, b_cls,
                     *, tile_b=8, tile_p=None):
    """Pallas-backed fused forward pass.  x_nchw: (B, C_in, H, W) float32."""
    B = x_nchw.shape[0]
    F_DIM, C_IN, KH, KW = w_conv_oihw.shape
    NC = w_cls.shape[0]

    # im2col in NHWC tap order (i, j, c)
    x_nhwc = jnp.transpose(x_nchw, (0, 2, 3, 1))
    patches, _ = extract_patches_nhwc(x_nhwc, kh=KH, kw=KW)
    _, P, K = patches.shape

    if tile_p is None:
        tile_p = _pick_tile_p(P, K, tile_b)

    # Lane alignment: F, NC padded to 128 (on v6e/v7x with F > 128 a 256
    # multiple fills the 2x256 MXU better); K left unpadded (block = full dim).
    F_pad = _round_up(F_DIM, 128)
    NC_pad = _round_up(NC, 128)
    B_pad = _round_up(B, tile_b)
    P_pad = _round_up(P, tile_p)

    # Patches: cast to bf16 then pad batch / spatial only (fusible, no K pad).
    patches_p = jnp.pad(patches.astype(jnp.bfloat16),
                        ((0, B_pad - B), (0, P_pad - P), (0, 0)))

    # Conv weight (F,C,kh,kw) -> (kh,kw,C,F) -> (K,F), F zero-padded, bf16.
    w1 = jnp.transpose(w_conv_oihw, (2, 3, 1, 0)).reshape(KH * KW * C_IN, F_DIM)
    w1_p = jnp.pad(w1.astype(jnp.bfloat16), ((0, 0), (0, F_pad - F_DIM)))
    b1_p = jnp.pad(b_conv.astype(jnp.float32)[None, :],
                   ((0, 0), (0, F_pad - F_DIM)))

    # Classifier weight (NC,F) -> (F,NC), 1/P avg-pool factor folded in, bf16.
    w2 = (w_cls.T / float(P)).astype(jnp.bfloat16)         # (F, NC)
    w2_p = jnp.pad(w2, ((0, F_pad - F_DIM), (0, NC_pad - NC)))

    # Padded spatial rows are all-zero patches -> each contributes exactly
    # relu(b_conv) to the pooled sum; fold the correction into the bias.
    pad_rows = P_pad - P
    relu_b1 = jnp.maximum(b_conv.astype(jnp.float32), 0.0)
    corr = float(pad_rows) * (relu_b1 @ w2.astype(jnp.float32))   # (NC,)
    b2_eff = b_cls.astype(jnp.float32) - corr
    b2_p = jnp.pad(b2_eff[None, :], ((0, 0), (0, NC_pad - NC)))

    grid = (B_pad // tile_b, P_pad // tile_p)

    # Cost estimate from true (unpadded) dims.
    flops = 2 * B * P * K * F_DIM + 2 * B * F_DIM * NC
    bytes_accessed = (B * P * K * 2                     # patches bf16
                      + K * F_DIM * 2 + F_DIM * 4      # conv weight/bias
                      + F_DIM * NC * 2 + NC * 4        # classifier weight/bias
                      + B * NC * 4)                    # logits

    out = pl.pallas_call(
        birdclef_kernel,
        out_shape=jax.ShapeDtypeStruct((B_pad, NC_pad), jnp.float32),
        grid_spec=pltpu.PrefetchScalarGridSpec(
            num_scalar_prefetch=0,
            grid=grid,
            in_specs=[
                # On v5e, pipeline_mode=pl.Buffered(3) here can further hide DMA.
                pl.BlockSpec((tile_b, tile_p, K), lambda b, p: (b, p, 0)),
                pl.BlockSpec((K, F_pad), lambda b, p: (0, 0)),
                pl.BlockSpec((1, F_pad), lambda b, p: (0, 0)),
                pl.BlockSpec((F_pad, NC_pad), lambda b, p: (0, 0)),
                pl.BlockSpec((1, NC_pad), lambda b, p: (0, 0)),
            ],
            out_specs=pl.BlockSpec((tile_b, NC_pad), lambda b, p: (b, 0)),
            scratch_shapes=[pltpu.VMEM((tile_b, F_pad), jnp.float32)],
        ),
        compiler_params=pltpu.CompilerParams(
            dimension_semantics=("parallel", "arbitrary")),
        cost_estimate=pl.CostEstimate(
            flops=flops, transcendentals=0, bytes_accessed=bytes_accessed),
    )(patches_p, w1_p, b1_p, w2_p, b2_p)

    # Drop batch / class-lane padding (padded batch rows hold garbage logits).
    return out[:B, :NC]


# Pure-JAX f32 reference (mirrors the PyTorch forward semantics, NCHW).
def reference_forward(x_nchw, w_conv_oihw, b_conv, w_cls, b_cls):
    feat = lax.conv_general_dilated(
        x_nchw, w_conv_oihw, window_strides=(2, 2),
        padding=((1, 1), (1, 1)),
        dimension_numbers=("NCHW", "OIHW", "NCHW"))
    feat = feat + b_conv[None, :, None, None]
    feat = jnp.maximum(feat, 0.0)
    pooled = jnp.mean(feat, axis=(2, 3))          # AdaptiveAvgPool2d(1) + view
    return pooled @ w_cls.T + b_cls               # nn.Linear


# --------------------------------- main ------------------------------------ #

if __name__ == "__main__":
    # Small shapes consistent with the module:
    #   batch=2, cfg.in_channels=4, spectrogram 16x16,
    #   backbone_out (feat_dim)=32, num_classes=8.
    B, C_IN, H, W = 2, 4, 16, 16
    FEAT, NUM_CLASSES = 32, 8
    KH = KW = 3

    key = jax.random.PRNGKey(0)
    kx, kw1, kb1, kw2, kb2 = jax.random.split(key, 5)

    x = jax.random.normal(kx, (B, C_IN, H, W), dtype=jnp.float32)
    w_conv_oihw = 0.1 * jax.random.normal(kw1, (FEAT, C_IN, KH, KW), jnp.float32)
    b_conv = 0.1 * jax.random.normal(kb1, (FEAT,), jnp.float32)
    w_cls = 0.1 * jax.random.normal(kw2, (NUM_CLASSES, FEAT), jnp.float32)
    b_cls = 0.1 * jax.random.normal(kb2, (NUM_CLASSES,), jnp.float32)

    logits = birdclef_forward(x, w_conv_oihw, b_conv, w_cls, b_cls)
    logits = jax.block_until_ready(logits)

    ref = reference_forward(x, w_conv_oihw, b_conv, w_cls, b_cls)
    ref = jax.block_until_ready(ref)

    assert logits.shape == (B, NUM_CLASSES), logits.shape
    # bf16 patch / weight inputs with f32 accumulation: tolerance relaxed vs.
    # the pure-f32 path.
    err = float(jnp.max(jnp.abs(logits - ref)))
    assert jnp.allclose(logits, ref, atol=5e-2, rtol=5e-2), f"max abs err {err}"

    print("KERNEL_OK")
</pallas_src>

<mosaic_0001>
module attributes {stable_mosaic.version = 11 : i64} {
  func.func @birdclef_kernel(%arg0: i32, %arg1: i32, %arg2: memref<8x64x36xbf16, #tpu.memory_space<vmem>>, %arg3: memref<36x128xbf16, #tpu.memory_space<vmem>>, %arg4: memref<1x128xf32, #tpu.memory_space<vmem>>, %arg5: memref<128x128xbf16, #tpu.memory_space<vmem>>, %arg6: memref<1x128xf32, #tpu.memory_space<vmem>>, %arg7: memref<8x128xf32, #tpu.memory_space<vmem>>, %arg8: memref<8x128xf32, #tpu.memory_space<vmem>>) attributes {dimension_semantics = [#tpu.dimension_semantics<parallel>, #tpu.dimension_semantics<arbitrary>], iteration_bounds = array<i64: 1, 1>, scalar_prefetch = 0 : i64, scratch_operands = 1 : i64, tpu.core_type = #tpu.core_type<tc>, window_params = [{transform_indices = @transform_0, window_bounds = array<i64: 8, 64, 36>}, {pipeline_mode = #tpu.pipeline_mode<synchronous>, transform_indices = @transform_1, window_bounds = array<i64: 36, 128>}, {pipeline_mode = #tpu.pipeline_mode<synchronous>, transform_indices = @transform_2, window_bounds = array<i64: 1, 128>}, {pipeline_mode = #tpu.pipeline_mode<synchronous>, transform_indices = @transform_3, window_bounds = array<i64: 128, 128>}, {pipeline_mode = #tpu.pipeline_mode<synchronous>, transform_indices = @transform_4, window_bounds = array<i64: 1, 128>}, {transform_indices = @transform_5, window_bounds = array<i64: 8, 128>}]} {
    %c0_i32 = arith.constant 0 : i32
    %0 = arith.cmpi eq, %arg1, %c0_i32 : i32
    %1 = arith.extui %0 : i1 to i32
    %c0_i32_0 = arith.constant 0 : i32
    %2 = arith.cmpi ne, %1, %c0_i32_0 : i32
    scf.if %2 {
      %cst_15 = arith.constant 0.000000e+00 : f32
      %20 = vector.broadcast %cst_15 : f32 to vector<8x128xf32>
      %c0_16 = arith.constant 0 : index
      %c0_17 = arith.constant 0 : index
      %21 = vector.load %arg8[%c0_16, %c0_17] : memref<8x128xf32, #tpu.memory_space<vmem>>, vector<8x128xf32>
      tpu.vector_store %arg8[%c0_16, %c0_17], %20 {strides = array<i32>} : memref<8x128xf32, #tpu.memory_space<vmem>>, vector<8x128xf32>,
    } else {
    }
    %c0 = arith.constant 0 : index
    %c0_1 = arith.constant 0 : index
    %c0_2 = arith.constant 0 : index
    %3 = vector.load %arg2[%c0, %c0_1, %c0_2] : memref<8x64x36xbf16, #tpu.memory_space<vmem>>, vector<8x64x36xbf16>
    %4 = vector.shape_cast %3 : vector<8x64x36xbf16> to vector<512x36xbf16>
    %c0_3 = arith.constant 0 : index
    %c0_4 = arith.constant 0 : index
    %5 = vector.load %arg3[%c0_3, %c0_4] : memref<36x128xbf16, #tpu.memory_space<vmem>>, vector<36x128xbf16>
    %cst = arith.constant dense<0.000000e+00> : vector<512x128xf32>
    %6 = tpu.matmul %4, %5, %cst {dimension_numbers = #tpu.dot_dimension_numbers<[1], [0], [0], [1], [0, 0, 1, 1], [], []>} : vector<512x36xbf16>, vector<36x128xbf16>, vector<512x128xf32> -> vector<512x128xf32>
    %c0_5 = arith.constant 0 : index
    %c0_6 = arith.constant 0 : index
    %7 = vector.load %arg4[%c0_5, %c0_6] : memref<1x128xf32, #tpu.memory_space<vmem>>, vector<1x128xf32>
    %8 = vector.broadcast %7 : vector<1x128xf32> to vector<512x128xf32>
    %9 = arith.addf %6, %8 : vector<512x128xf32>
    %cst_7 = arith.constant 0.000000e+00 : f32
    %10 = vector.broadcast %cst_7 : f32 to vector<512x128xf32>
    %11 = arith.maximumf %9, %10 : vector<512x128xf32>
    %c0_8 = arith.constant 0 : index
    %c0_9 = arith.constant 0 : index
    %12 = vector.load %arg8[%c0_8, %c0_9] : memref<8x128xf32, #tpu.memory_space<vmem>>, vector<8x128xf32>
    %13 = vector.shape_cast %11 : vector<512x128xf32> to vector<8x64x128xf32>
    %cst_10 = arith.constant dense<0.000000e+00> : vector<8x128xf32>
    %14 = vector.multi_reduction <add>, %13, %cst_10 [1] : vector<8x64x128xf32> to vector<8x128xf32>
    %15 = arith.addf %12, %14 : vector<8x128xf32>
    %c0_11 = arith.constant 0 : index
    %c0_12 = arith.constant 0 : index
    %16 = vector.load %arg8[%c0_11, %c0_12] : memref<8x128xf32, #tpu.memory_space<vmem>>, vector<8x128xf32>
    tpu.vector_store %arg8[%c0_11, %c0_12], %15 {strides = array<i32>} : memref<8x128xf32, #tpu.memory_space<vmem>>, vector<8x128xf32>,
    %c0_i32_13 = arith.constant 0 : i32
    %17 = arith.cmpi eq, %arg1, %c0_i32_13 : i32
    %18 = arith.extui %17 : i1 to i32
    %c0_i32_14 = arith.constant 0 : i32
    %19 = arith.cmpi ne, %18, %c0_i32_14 : i32
    scf.if %19 {
      %c0_15 = arith.constant 0 : index
      %c0_16 = arith.constant 0 : index
      %20 = vector.load %arg8[%c0_15, %c0_16] : memref<8x128xf32, #tpu.memory_space<vmem>>, vector<8x128xf32>
      %21 = arith.truncf %20 : vector<8x128xf32> to vector<8x128xbf16>
      %c0_17 = arith.constant 0 : index
      %c0_18 = arith.constant 0 : index
      %22 = vector.load %arg5[%c0_17, %c0_18] : memref<128x128xbf16, #tpu.memory_space<vmem>>, vector<128x128xbf16>
      %cst_19 = arith.constant dense<0.000000e+00> : vector<8x128xf32>
      %23 = tpu.matmul %21, %22, %cst_19 {dimension_numbers = #tpu.dot_dimension_numbers<[1], [0], [0], [1], [0, 0, 1, 1], [], []>} : vector<8x128xbf16>, vector<128x128xbf16>, vector<8x128xf32> -> vector<8x128xf32>
      %c0_20 = arith.constant 0 : index
      %c0_21 = arith.constant 0 : index
      %24 = vector.load %arg6[%c0_20, %c0_21] : memref<1x128xf32, #tpu.memory_space<vmem>>, vector<1x128xf32>
      %25 = vector.broadcast %24 : vector<1x128xf32> to vector<8x128xf32>
      %26 = arith.addf %23, %25 : vector<8x128xf32>
      %c0_22 = arith.constant 0 : index
      %c0_23 = arith.constant 0 : index
      %27 = vector.load %arg7[%c0_22, %c0_23] : memref<8x128xf32, #tpu.memory_space<vmem>>, vector<8x128xf32>
      tpu.vector_store %arg7[%c0_22, %c0_23], %26 {strides = array<i32>} : memref<8x128xf32, #tpu.memory_space<vmem>>, vector<8x128xf32>,
    } else {
    }
    return
  }
  func.func @transform_0(%arg0: i32, %arg1: i32) -> (i32, i32, i32) {
    %c0_i32 = arith.constant 0 : i32
    %c0_i32_0 = arith.constant 0 : i32
    return %arg0, %arg1, %c0_i32 : i32, i32, i32
  }
  func.func @transform_1(%arg0: i32, %arg1: i32) -> (i32, i32) {
    %c0_i32 = arith.constant 0 : i32
    %c0_i32_0 = arith.constant 0 : i32
    %c0_i32_1 = arith.constant 0 : i32
    return %c0_i32, %c0_i32_0 : i32, i32
  }
  func.func @transform_2(%arg0: i32, %arg1: i32) -> (i32, i32) {
    %c0_i32 = arith.constant 0 : i32
    %c0_i32_0 = arith.constant 0 : i32
    %c0_i32_1 = arith.constant 0 : i32
    return %c0_i32, %c0_i32_0 : i32, i32
  }
  func.func @transform_3(%arg0: i32, %arg1: i32) -> (i32, i32) {
    %c0_i32 = arith.constant 0 : i32
    %c0_i32_0 = arith.constant 0 : i32
    %c0_i32_1 = arith.constant 0 : i32
    return %c0_i32, %c0_i32_0 : i32, i32
  }
  func.func @transform_4(%arg0: i32, %arg1: i32) -> (i32, i32) {
    %c0_i32 = arith.constant 0 : i32
    %c0_i32_0 = arith.constant 0 : i32
    %c0_i32_1 = arith.constant 0 : i32
    return %c0_i32, %c0_i32_0 : i32, i32
  }
  func.func @transform_5(%arg0: i32, %arg1: i32) -> (i32, i32) {
    %c0_i32 = arith.constant 0 : i32
    %c0_i32_0 = arith.constant 0 : i32
    return %arg0, %c0_i32 : i32, i32
  }
}

</mosaic_0001>

<bundles_post_ra>
// kernel: tpu_custom_call.1
= control target key start
LH: loop header
LB: loop body
LE: loop exit
PB: predicated region body
PF: predicated region fallthrough
CT: control target
= control target key end

     0   :  { %vm375_vm0 = vcmask 1041408   ;;  %vm278_vm1 = vcmask 293888   ;;  %s1626_s0 = inlined_call_operand.vmem [shape: bf16[8,64,36], index: 0, kind: input, shape index: {}]   ;;  %s1627_s1 = inlined_call_operand.vmem [shape: bf16[36,128], index: 1, kind: input, shape index: {}]   ;;  %s1628_s2 = inlined_call_operand.vmem [shape: f32[1,128], index: 2, kind: input, shape index: {}]   ;;  %s1629_s3 = inlined_call_operand.vmem [shape: bf16[128,128], index: 3, kind: input, shape index: {}]   ;;  %s1630_s4 = inlined_call_operand.vmem [shape: f32[1,128], index: 4, kind: input, shape index: {}]   ;;  %s1631_s5 = inlined_call_operand.hbm [shape: f32[8,128], index: 5, kind: output, shape index: {}]  }
   0x1   :  { %v1215_v0 = vld [vmem:[%s1627_s1 + $0x10] ss:$0 sps:$4 sm:$0x33]   ;;  %v1216_v1 = vld [vmem:[%s1627_s1 + $0x8] sm:$0xff]   ;;  %v1218_v3 = vld [vmem:[%s1626_s0] sm:$0xff]  }
   0x2   :  { %1210 = vmatprep.subr.msk.bf16.mxu0 %vm375_vm0, %v1215_v0  ;;  %v377_v2 = vsel %vm375_vm0, %v1215_v0, 0  ;;  %1211 = vmatprep.subr.msk.bf16.mxu1 %vm375_vm0, %v1215_v0  ;;  %v1217_v4 = vld [vmem:[%s1627_s1] sm:$0xff]   ;;  %v1222_v5 = vld [vmem:[%s1626_s0 + $0x90] sm:$0xff]   ;;  %v1219_v6 = vld [vmem:[%s1626_s0 + $0x8] sm:$0xff]  }
   0x3   :  { %1115 = vmatpush3.bf16.msra.mxu0 %v377_v2  ;;  %1207 = vmatpush3.bf16.msra.mxu1 %v377_v2  ;;  %v1220_v7 = vld [vmem:[%s1626_s0 + $0x10] sm:$0xff]   ;;  %v1223_v8 = vld [vmem:[%s1626_s0 + $0x98] sm:$0xff]   ;;  %v1226_v9 = vld [vmem:[%s1626_s0 + $0xa0] sm:$0xff]  }
   0x4   :  { %1116 = vmatprep.subr.bf16.mxu0 %v1216_v1  ;;  %1205 = vmatprep.subr.bf16.mxu1 %v1216_v1  ;;  %v1221_v10 = vld [vmem:[%s1626_s0 + $0x18] sm:$0xff]   ;;  %v1224_v11 = vld [vmem:[%s1626_s0 + $0x20] sm:$0xff]   ;;  %v1227_v12 = vld [vmem:[%s1626_s0 + $0xa8] sm:$0xff]  }
   0x5   :  { %1120 = vmatprep.mubr.msk.bf16.mxu0 %vm278_vm1, %v1218_v3  ;;  %1156 = vmatprep.mubr.msk.bf16.mxu1 %vm278_vm1, %v1222_v5  ;;  %v1230_v13 = vld [vmem:[%s1626_s0 + $0xb0] sm:$0xff]   ;;  %v1225_v14 = vld [vmem:[%s1626_s0 + $0x28] sm:$0xff]   ;;  %v1231_v16 = vld [vmem:[%s1626_s0 + $0xb8] sm:$0xff]  }
   0x6   :  { %v1228_v15 = vld [vmem:[%s1626_s0 + $0x30] sm:$0xff]   ;;  %v1234_v17 = vld [vmem:[%s1626_s0 + $0xc0] sm:$0xff]   ;;  %v1229_v18 = vld [vmem:[%s1626_s0 + $0x38] sm:$0xff]  }
   0x7   :  { %1117 = vmatpush3.bf16.msra.mxu0 %v1216_v1  ;;  %1208 = vmatpush3.bf16.msra.mxu1 %v1216_v1  ;;  %v1232_v19 = vld [vmem:[%s1626_s0 + $0x40] sm:$0xff]   ;;  %v1235_v20 = vld [vmem:[%s1626_s0 + $0xc8] sm:$0xff]   ;;  %v1238_v21 = vld [vmem:[%s1626_s0 + $0xd0] sm:$0xff]  }
   0x8   :  { %1118 = vmatprep.subr.bf16.mxu0 %v1217_v4  ;;  %1206 = vmatprep.subr.bf16.mxu1 %v1217_v4 }
   0xb   :  { %1119 = vmatpush3.bf16.msra.mxu0 %v1217_v4  ;;  %1209 = vmatpush3.bf16.msra.mxu1 %v1217_v4 }
   0xe   :  { %1121 = vmatmul.mubr.msk.bf16.vlgmr.msra.gmra.mxu0 %vm278_vm1, %v1219_v6  ;;  %1157 = vmatmul.mubr.msk.bf16.vlgmr.msra.gmra.mxu1 %vm278_vm1, %v1223_v8 }
   0xf   :  { %1124 = vmatprep.mubr.msk.bf16.mxu0 %vm278_vm1, %v1220_v7  ;;  %1160 = vmatprep.mubr.msk.bf16.mxu1 %vm278_vm1, %v1226_v9 }
  0x16   :  { %1125 = vmatmul.mubr.msk.bf16.gmra.mxu0 %vm278_vm1, %v1221_v10  ;;  %1161 = vmatmul.mubr.msk.bf16.gmra.mxu1 %vm278_vm1, %v1227_v12 }
  0x17   :  { %1128 = vmatprep.mubr.msk.bf16.mxu0 %vm278_vm1, %v1224_v11  ;;  %1164 = vmatprep.mubr.msk.bf16.mxu1 %vm278_vm1, %v1230_v13 }
  0x1e   :  { %1129 = vmatmul.mubr.msk.bf16.gmra.mxu0 %vm278_vm1, %v1225_v14  ;;  %1165 = vmatmul.mubr.msk.bf16.gmra.mxu1 %vm278_vm1, %v1231_v16 }
  0x1f   :  { %1132 = vmatprep.mubr.msk.bf16.mxu0 %vm278_vm1, %v1228_v15  ;;  %1168 = vmatprep.mubr.msk.bf16.mxu1 %vm278_vm1, %v1234_v17 }
  0x26   :  { %1133 = vmatmul.mubr.msk.bf16.gmra.mxu0 %vm278_vm1, %v1229_v18  ;;  %1169 = vmatmul.mubr.msk.bf16.gmra.mxu1 %vm278_vm1, %v1235_v20 }
  0x27   :  { %1136 = vmatprep.mubr.msk.bf16.mxu0 %vm278_vm1, %v1232_v19  ;;  %1172 = vmatprep.mubr.msk.bf16.mxu1 %vm278_vm1, %v1238_v21 }
  0x28   :  { %10 = vsyncpa [#allocation4], 0  ;;  %v1233_v22 = vld [vmem:[%s1626_s0 + $0x48] sm:$0xff]   ;;  %v1239_v23 = vld [vmem:[%s1626_s0 + $0xd8] sm:$0xff]   ;;  %v1280_v37 = vmov 0.0   ;;  %vm1281_vm2 = vmmov 0  }
  0x29   :  { %v1236_v24 = vld [vmem:[%s1626_s0 + $0x50] sm:$0xff]   ;;  %v1242_v25 = vld [vmem:[%s1626_s0 + $0xe0] sm:$0xff]   ;;  %v1237_v26 = vld [vmem:[%s1626_s0 + $0x58] sm:$0xff]   ;;  %1184 = vmatprep.subr.bf16.mxu1 %v1280_v37  ;;  %vm845_vm3 = vcmask 1041409   ;;  %vm847_vm4 = vcmask 1042434   ;;  %vm849_vm5 = vcmask 1043459  }
  0x2a   :  { %v1243_v27 = vld [vmem:[%s1626_s0 + $0xe8] sm:$0xff]   ;;  %v1240_v28 = vld [vmem:[%s1626_s0 + $0x60] sm:$0xff]   ;;  %v1246_v29 = vld [vmem:[%s1626_s0 + $0xf0] sm:$0xff]   ;;  %vm851_vm6 = vcmask 1044484   ;;  %vm853_vm7 = vcmask 1045509   ;;  %vm855_vm8 = vcmask 1046534  }
  0x2b   :  { %v1241_v30 = vld [vmem:[%s1626_s0 + $0x68] sm:$0xff]   ;;  %v1247_v31 = vld [vmem:[%s1626_s0 + $0xf8] sm:$0xff]   ;;  %v1244_v32 = vld [vmem:[%s1626_s0 + $0x70] sm:$0xff]   ;;  %vm857_vm9 = vcmask 1047559   ;;  %s1282_s27 = smov [#allocation3]  }
  0x2c   :  { %v1245_v33 = vld [vmem:[%s1626_s0 + $0x78] sm:$0xff]   ;;  %v1248_v34 = vld [vmem:[%s1626_s0 + $0x80] sm:$0xff]   ;;  %v1249_v35 = vld [vmem:[%s1626_s0 + $0x88] sm:$0xff]   ;;  %s985_s28 = sshll.u32 %s1282_s27, 4  ;;  %s986_s28 = int_to_ptr.vmem [resolvable:$true] %s985_s28 }
  0x2d   :  { %v1250_v36 = vld [vmem:[%s1629_s3 + $0x38] sm:$0xff]   ;;  %v1251_v38 = vld [vmem:[%s1629_s3 + $0x30] sm:$0xff]   ;;  %v1252_v39 = vld [vmem:[%s1629_s3 + $0x28] sm:$0xff]   ;;  %s1258_s29 = scalar_lea.vmem %s986_s28, 128  ;;  %p1263_p1 = scmp.lt.s32.totalorder %s986_s28, %s986_s28 }
  0x2e   :  { %1137 = vmatmul.mubr.msk.bf16.gmra.mxu0 %vm278_vm1, %v1233_v22  ;;  %1173 = vmatmul.mubr.msk.bf16.gmra.mxu1 %vm278_vm1, %v1239_v23  ;;  %v1253_v40 = vld [vmem:[%s1629_s3 + $0x20] sm:$0xff]   ;;  %v1254_v41 = vld [vmem:[%s1629_s3 + $0x18] sm:$0xff]   ;;  %v1255_v42 = vld [vmem:[%s1629_s3 + $0x10] sm:$0xff]   ;;  %p1259_p0 = scmp.ne.s32.totalorder %s986_s28, %s1258_s29  ;;  %p1264_p2 = scmp.lt.s32.totalorder %s1258_s29, %s1258_s29 }
  0x2f   :  { %1140 = vmatprep.mubr.msk.bf16.mxu0 %vm278_vm1, %v1236_v24  ;;  %1176 = vmatprep.mubr.msk.bf16.mxu1 %vm278_vm1, %v1242_v25  ;;  %v1256_v43 = vld [vmem:[%s1629_s3 + $0x8] sm:$0xff]   ;;  %v1257_v44 = vld [vmem:[%s1629_s3] sm:$0xff]  }
  0x30   :  { %1185 = vmatpush3.bf16.msra.mxu1 %v1250_v36  ;;  %v1481_v49 = vld [vmem:[%s1628_s2] ss:$0 sm:$0xff]  ;;  %p1265_p3 = por %p1264_p2, %p1263_p1 }
  0x31   :  { %1186 = vmatprep.subr.bf16.mxu1 %v1280_v37 }
  0x32   :  { %p1266_p4 = pnand %p1265_p3, %p1259_p0 }
  0x34   :  { %1187 = vmatpush3.bf16.msra.mxu1 %v1251_v38 }
  0x35   :  { %1188 = vmatprep.subr.bf16.mxu1 %v1280_v37 }
  0x36   :  { %1141 = vmatmul.mubr.msk.bf16.gmra.mxu0 %vm278_vm1, %v1237_v26  ;;  %1177 = vmatmul.mubr.msk.bf16.gmra.mxu1 %vm278_vm1, %v1243_v27 }
  0x37   :  { %1144 = vmatprep.mubr.msk.bf16.mxu0 %vm278_vm1, %v1240_v28  ;;  %1180 = vmatprep.mubr.msk.bf16.mxu1 %vm278_vm1, %v1246_v29 }
  0x38   :  { %1189 = vmatpush3.bf16.msra.mxu1 %v1252_v39 }
  0x39   :  { %1190 = vmatprep.subr.bf16.mxu1 %v1280_v37 }
  0x3c   :  { %1191 = vmatpush3.bf16.msra.mxu1 %v1253_v40 }
  0x3d   :  { %1192 = vmatprep.subr.bf16.mxu1 %v1280_v37 }
  0x3e   :  { %1145 = vmatmul.mubr.msk.bf16.gmra.mxu0 %vm278_vm1, %v1241_v30  ;;  %1181 = vmatmul.mubr.msk.bf16.gmra.mxu1 %vm278_vm1, %v1247_v31 }
  0x3f   :  { %1148 = vmatprep.mubr.msk.bf16.mxu0 %vm278_vm1, %v1244_v32  ;;  %1200 = vmatprep.mubr.msk.bf16.mxu1 %vm1281_vm2, %v1280_v37 }
  0x40   :  { %1193 = vmatpush3.bf16.msra.mxu1 %v1254_v41 }
  0x41   :  { %1194 = vmatprep.subr.bf16.mxu1 %v1280_v37 }
  0x44   :  { %1195 = vmatpush3.bf16.msra.mxu1 %v1255_v42 }
  0x45   :  { %1196 = vmatprep.subr.bf16.mxu1 %v1280_v37 }
  0x46   :  { %1149 = vmatmul.mubr.msk.bf16.gmra.mxu0 %vm278_vm1, %v1245_v33 }
  0x47   :  { %1152 = vmatprep.mubr.msk.bf16.mxu0 %vm278_vm1, %v1248_v34 }
  0x48   :  { %1197 = vmatpush3.bf16.msra.mxu1 %v1256_v43 }
  0x49   :  { %1198 = vmatprep.subr.bf16.mxu1 %v1280_v37 }
  0x4c   :  { %1199 = vmatpush3.bf16.msra.mxu1 %v1257_v44 }
  0x4e   :  { %1153 = vmatmul.mubr.msk.bf16.gmra.mxu0 %vm278_vm1, %v1249_v35 }
  0xce   :  { %v1122_v45 = vpop.f32.mrf.mxu0  ;;  %v1474_v46 = vpop.f32.mrf.mxu1 }
  0xcf   :  { %v422_v55 = vadd.f32 %v1122_v45, %v1481_v49 }
  0xd0   :  { %v413_v47 = vpop.f32.mrf.mxu0  ;;  %v1476_v48 = vpop.f32.mrf.mxu1 }
  0xd1   :  { %v414_v52 = vadd.f32 %v1481_v49, %v413_v47  ;;  %v670_v0 = vmax.f32 %v422_v55, 0.0 }
  0xd2   :  { %v1123_v50 = vpop.f32.mrf.mxu0  ;;  %v1483_v51 = vpop.f32.mrf.mxu1 }
  0xd3   :  { %v668_v59 = vmax.f32 %v414_v52, 0.0  ;;  %v425_v60 = vadd.f32 %v1123_v50, %v1481_v49 }
  0xd4   :  { %v416_v53 = vpop.f32.mrf.mxu0  ;;  %v1486_v54 = vpop.f32.mrf.mxu1 }
  0xd5   :  { %v417_v56 = vadd.f32 %v1481_v49, %v416_v53  ;;  %v671_v5 = vmax.f32 %v425_v60, 0.0 }
  0xd6   :  { %v1126_v57 = vpop.f32.mrf.mxu0  ;;  %v1162_v58 = vpop.f32.mrf.mxu1 }
  0xd7   :  { %v669_v61 = vmax.f32 %v417_v56, 0.0  ;;  %v438_v9 = vadd.f32 %v1126_v57, %v1481_v49  ;;  %v582_v41 = vadd.f32 %v1162_v58, %v1481_v49 }
  0xd8   :  { %v429_v62 = vpop.f32.mrf.mxu0  ;;  %v573_v63 = vpop.f32.mrf.mxu1 }
  0xd9   :  { %v733_v1 = vadd.f32 %v669_v61, %v668_v59  ;;  %v430_v2 = vadd.f32 %v1481_v49, %v429_v62  ;;  %v674_v20 = vmax.f32 %v438_v9, 0.0  ;;  %v574_v35 = vadd.f32 %v1481_v49, %v573_v63 }
  0xda   :  { %v1127_v3 = vpop.f32.mrf.mxu0  ;;  %v1163_v4 = vpop.f32.mrf.mxu1  ;;  %v710_v56 = vmax.f32 %v582_v41, 0.0 }
  0xdb   :  { %v734_v6 = vadd.f32 %v733_v1, %v670_v0  ;;  %v672_v10 = vmax.f32 %v430_v2, 0.0  ;;  %v441_v16 = vadd.f32 %v1127_v3, %v1481_v49  ;;  %v708_v42 = vmax.f32 %v574_v35, 0.0 }
  0xdc   :  { %v432_v7 = vpop.f32.mrf.mxu0  ;;  %v576_v8 = vpop.f32.mrf.mxu1  ;;  %v585_v50 = vadd.f32 %v1163_v4, %v1481_v49 }
  0xdd   :  { %v735_v11 = vadd.f32 %v734_v6, %v671_v5  ;;  %v433_v12 = vadd.f32 %v1481_v49, %v432_v7  ;;  %v675_v24 = vmax.f32 %v441_v16, 0.0  ;;  %v577_v36 = vadd.f32 %v1481_v49, %v576_v8 }
  0xde   :  { %v1130_v13 = vpop.f32.mrf.mxu0  ;;  %v1166_v14 = vpop.f32.mrf.mxu1  ;;  %v711_v62 = vmax.f32 %v585_v50, 0.0 }
  0xdf   :  { %v736_v15 = vadd.f32 %v735_v11, %v672_v10  ;;  %v673_v17 = vmax.f32 %v433_v12, 0.0  ;;  %v709_v43 = vmax.f32 %v577_v36, 0.0  ;;  %v454_v2 = vadd.f32 %v1130_v13, %v1481_v49 }
  0xe0   :  { %v445_v18 = vpop.f32.mrf.mxu0  ;;  %v589_v19 = vpop.f32.mrf.mxu1  ;;  %v1530_v6 = vadd.f32 %v1166_v14, %v1481_v49 }
  0xe1   :  { %v737_v21 = vadd.f32 %v736_v15, %v673_v17  ;;  %v446_v55 = vadd.f32 %v1481_v49, %v445_v18  ;;  %v798_v57 = vadd.f32 %v709_v43, %v708_v42  ;;  %v590_v5 = vadd.f32 %v1481_v49, %v589_v19 }
  0xe2   :  { %v1131_v22 = vpop.f32.mrf.mxu0  ;;  %v1495_v23 = vpop.f32.mrf.mxu1  ;;  %v678_v18 = vmax.f32 %v454_v2, 0.0 }
  0xe3   :  { %v738_v25 = vadd.f32 %v737_v21, %v674_v20  ;;  %v676_v3 = vmax.f32 %v446_v55, 0.0  ;;  %v799_v4 = vadd.f32 %v798_v57, %v710_v56  ;;  %v457_v19 = vadd.f32 %v1131_v22, %v1481_v49 }
  0xe4   :  { %v448_v26 = vpop.f32.mrf.mxu0  ;;  %v592_v27 = vpop.f32.mrf.mxu1  ;;  %v712_v20 = vmax.f32 %v590_v5, 0.0  ;;  %v714_v21 = vmax.f32 %v1530_v6, 0.0 }
  0xe5   :  { %v1497_v28 = vadd.f32 %v738_v25, %v675_v24  ;;  %v449_v47 = vadd.f32 %v1481_v49, %v448_v26  ;;  %v800_v14 = vadd.f32 %v799_v4, %v711_v62  ;;  %v1541_v36 = vadd.f32 %v1481_v49, %v592_v27 }
  0xe6   :  { %v1499_v29 = vpop.f32.mrf.mxu0  ;;  %v1170_v30 = vpop.f32.mrf.mxu1  ;;  %v679_v50 = vmax.f32 %v457_v19, 0.0 }
  0xe7   :  { %v677_v58 = vmax.f32 %v449_v47, 0.0  ;;  %v1550_v55 = vadd.f32 %v1499_v29, %v1481_v49  ;;  %v1554_v56 = vadd.f32 %v800_v14, %v712_v20  ;;  %v713_v62 = vmax.f32 %v1541_v36, 0.0 }
  0xe8   :  { %v1501_v31 = vpop.f32.mrf.mxu0  ;;  %v605_v32 = vpop.f32.mrf.mxu1 }
  0xe9   :  { %v746_v10 = vadd.f32 %v677_v58, %v676_v3  ;;  %v606_v11 = vadd.f32 %v1481_v49, %v605_v32  ;;  %v462_v27 = vadd.f32 %v1481_v49, %v1501_v31 }
  0xea   :  { %v1503_v33 = vpop.f32.mrf.mxu0  ;;  %v1505_v34 = vpop.f32.mrf.mxu1 }
  0xeb   :  { %v747_v35 = vadd.f32 %v746_v10, %v678_v18  ;;  %v617_v2 = vadd.f32 %v1505_v34, %v1481_v49 }
  0xec   :  { %v1509_v37 = vpop.f32.mrf.mxu0  ;;  %v608_v38 = vpop.f32.mrf.mxu1 }
  0xed   :  { %v609_v16 = vadd.f32 %v1481_v49, %v608_v38  ;;  %v614_v38 = vadd.f32 %v1170_v30, %v1481_v49  ;;  %v465_v3 = vadd.f32 %v1481_v49, %v1509_v37  ;;  %v719_v19 = vmax.f32 %v617_v2, 0.0 }
  0xee   :  { %v1138_v39 = vpop.f32.mrf.mxu0  ;;  %v1511_v40 = vpop.f32.mrf.mxu1 }
  0xef   :  { %v486_v12 = vadd.f32 %v1138_v39, %v1481_v49  ;;  %v716_v39 = vmax.f32 %v606_v11, 0.0  ;;  %v717_v22 = vmax.f32 %v609_v16, 0.0 }
  0xf0   :  { %v477_v44 = vpop.f32.mrf.mxu0  ;;  %v1514_v45 = vpop.f32.mrf.mxu1 }
  0xf1   :  { %v478_v63 = vadd.f32 %v1481_v49, %v477_v44  ;;  %v686_v41 = vmax.f32 %v486_v12, 0.0  ;;  %v811_v4 = vadd.f32 %v717_v22, %v716_v39 }
  0xf2   :  { %v1139_v52 = vpop.f32.mrf.mxu0  ;;  %v1518_v53 = vpop.f32.mrf.mxu1 }
  0xf3   :  { %v684_v15 = vmax.f32 %v478_v63, 0.0  ;;  %v489_v42 = vadd.f32 %v1139_v52, %v1481_v49  ;;  %v718_v63 = vmax.f32 %v614_v38, 0.0 }
  0xf4   :  { %v480_v59 = vpop.f32.mrf.mxu0  ;;  %v1521_v60 = vpop.f32.mrf.mxu1 }
  0xf5   :  { %v481_v61 = vadd.f32 %v1481_v49, %v480_v59  ;;  %v687_v31 = vmax.f32 %v489_v42, 0.0 }
  0xf6   :  { %v1525_v0 = vpop.f32.mrf.mxu0  ;;  %v1178_v1 = vpop.f32.mrf.mxu1 }
  0xf7   :  { %v685_v7 = vmax.f32 %v481_v61, 0.0  ;;  %v646_v52 = vadd.f32 %v1178_v1, %v1481_v49  ;;  %v748_v61 = vadd.f32 %v747_v35, %v679_v50  ;;  %v1565_v1 = vadd.f32 %v1503_v33, %v1481_v49 }
  0xf8   :  { %v493_v8 = vpop.f32.mrf.mxu0  ;;  %v637_v9 = vpop.f32.mrf.mxu1  ;;  %v681_v33 = vmax.f32 %v465_v3, 0.0  ;;  %v682_v50 = vmax.f32 %v1550_v55, 0.0  ;;  %v502_v3 = vadd.f32 %v1525_v0, %v1481_v49 }
  0xf9   :  { %v759_v24 = vadd.f32 %v685_v7, %v684_v15  ;;  %v638_v26 = vadd.f32 %v1481_v49, %v637_v9  ;;  %v494_v5 = vadd.f32 %v1481_v49, %v493_v8  ;;  %v680_v9 = vmax.f32 %v462_v27, 0.0 }
  0xfa   :  { %v1535_v17 = vpop.f32.mrf.mxu0  ;;  %v1179_v13 = vpop.f32.mrf.mxu1  ;;  %v726_v15 = vmax.f32 %v646_v52, 0.0  ;;  %v683_v2 = vmax.f32 %v1565_v1, 0.0  ;;  %v630_v1 = vadd.f32 %v1511_v40, %v1481_v49  ;;  %v601_v40 = vadd.f32 %v1495_v23, %v1481_v49 }
  0xfb   :  { %v760_v30 = vadd.f32 %v759_v24, %v686_v41  ;;  %v724_v59 = vmax.f32 %v638_v26, 0.0  ;;  %v649_v11 = vadd.f32 %v1179_v13, %v1481_v49  ;;  %v749_v18 = vadd.f32 %v748_v61, %v680_v9 }
  0xfc   :  { %v496_v25 = vpop.f32.mrf.mxu0  ;;  %v640_v32 = vpop.f32.mrf.mxu1  ;;  %v812_v24 = vadd.f32 %v811_v4, %v718_v63  ;;  %v688_v26 = vmax.f32 %v494_v5, 0.0  ;;  %v622_v13 = vadd.f32 %v1481_v49, %v1514_v45  ;;  %v625_v61 = vadd.f32 %v1481_v49, %v1521_v60 }
  0xfd   :  { %v641_v44 = vadd.f32 %v1481_v49, %v640_v32  ;;  %v761_v12 = vadd.f32 %v760_v30, %v687_v31  ;;  %v497_v34 = vadd.f32 %v1481_v49, %v496_v25  ;;  %v727_v39 = vmax.f32 %v649_v11, 0.0 }
  0xfe   :  { %v1146_v43 = vpop.f32.mrf.mxu0  ;;  %v1546_v47 = vpop.f32.mrf.mxu1  ;;  %v750_v45 = vadd.f32 %v749_v18, %v681_v33  ;;  %v721_v0 = vmax.f32 %v625_v61, 0.0  ;;  %v505_v18 = vadd.f32 %v1535_v17, %v1481_v49  ;;  %v802_v17 = vadd.f32 %v1554_v56, %v713_v62 }
  0xff   :  { %v725_v58 = vmax.f32 %v641_v44, 0.0  ;;  %v518_v8 = vadd.f32 %v1146_v43, %v1481_v49  ;;  %v762_v41 = vadd.f32 %v761_v12, %v688_v26  ;;  %v689_v42 = vmax.f32 %v497_v34, 0.0 }
 0x100   :  { %v509_v57 = vpop.f32.mrf.mxu0  ;;  %v653_v29 = vpop.f32.mrf.mxu1  ;;  %v751_v34 = vadd.f32 %v750_v45, %v682_v50 }
 0x101   :  { %v510_v10 = vadd.f32 %v1481_v49, %v509_v57  ;;  %v824_v37 = vadd.f32 %v725_v58, %v724_v59  ;;  %v654_v44 = vadd.f32 %v1481_v49, %v653_v29  ;;  %v694_v27 = vmax.f32 %v518_v8, 0.0 }
 0x102   :  { %v1147_v7 = vpop.f32.mrf.mxu0  ;;  %v1572_v14 = vpop.f32.mrf.mxu1  ;;  %v720_v59 = vmax.f32 %v622_v13, 0.0  ;;  %v813_v58 = vadd.f32 %v812_v24, %v719_v19  ;;  %v763_v55 = vadd.f32 %v762_v41, %v689_v42  ;;  %v691_v42 = vmax.f32 %v505_v18, 0.0 }
 0x103   :  { %v692_v35 = vmax.f32 %v510_v10, 0.0  ;;  %v521_v25 = vadd.f32 %v1147_v7, %v1481_v49  ;;  %v825_v22 = vadd.f32 %v824_v37, %v726_v15  ;;  %v728_v4 = vmax.f32 %v654_v44, 0.0 }
 0x104   :  { %v512_v16 = vpop.f32.mrf.mxu0  ;;  %v656_v52 = vpop.f32.mrf.mxu1  ;;  %v814_v15 = vadd.f32 %v813_v58, %v720_v59  ;;  %v690_v37 = vmax.f32 %v502_v3, 0.0 }
 0x105   :  { %v513_v20 = vadd.f32 %v1481_v49, %v512_v16  ;;  %v695_v29 = vmax.f32 %v521_v25, 0.0  ;;  %v826_v5 = vadd.f32 %v825_v22, %v727_v39  ;;  %v657_v9 = vadd.f32 %v1481_v49, %v656_v52 }
 0x106   :  { %v1150_v32 = vpop.f32.mrf.mxu0  ;;  %v722_v39 = vmax.f32 %v630_v1, 0.0  ;;  %v815_v22 = vadd.f32 %v814_v15, %v721_v0  ;;  %v715_v52 = vmax.f32 %v601_v40, 0.0  ;;  %v566_v1 = vadd.f32 %v1474_v46, %v1481_v49 }
 0x107   :  { %v693_v38 = vmax.f32 %v513_v20, 0.0  ;;  %v534_v10 = vadd.f32 %v1150_v32, %v1481_v49  ;;  %v662_v20 = vadd.f32 %v1546_v47, %v1481_v49  ;;  %v827_v24 = vadd.f32 %v826_v5, %v728_v4 }
 0x108   :  { %v525_v43 = vpop.f32.mrf.mxu0  ;;  %v729_v26 = vmax.f32 %v657_v9, 0.0  ;;  %v764_v32 = vadd.f32 %v763_v55, %v690_v37  ;;  %v633_v47 = vadd.f32 %v1518_v53, %v1481_v49  ;;  %v803_v53 = vadd.f32 %v802_v17, %v714_v21 }
 0x109   :  { %v772_v30 = vadd.f32 %v693_v38, %v692_v35  ;;  %v526_v57 = vadd.f32 %v1481_v49, %v525_v43  ;;  %v698_v35 = vmax.f32 %v534_v10, 0.0  ;;  %v752_v38 = vadd.f32 %v751_v34, %v683_v2 }
 0x10a   :  { %v1151_v63 = vpop.f32.mrf.mxu0  ;;  %v730_v50 = vmax.f32 %v662_v20, 0.0  ;;  %v765_v36 = vadd.f32 %v764_v32, %v691_v42  ;;  %v723_v45 = vmax.f32 %v633_v47, 0.0  ;;  %v816_v58 = vadd.f32 %v815_v22, %v722_v39 }
 0x10b   :  { %v773_v31 = vadd.f32 %v772_v30, %v694_v27  ;;  %v696_v11 = vmax.f32 %v526_v57, 0.0  ;;  %v537_v33 = vadd.f32 %v1151_v63, %v1481_v49  ;;  %v665_v27 = vadd.f32 %v1572_v14, %v1481_v49 }
 0x10c   :  { %v528_v7 = vpop.f32.mrf.mxu0  ;;  %v828_v30 = vadd.f32 %v827_v24, %v729_v26  ;;  %v753_v3 = vrot.slane %v752_v38, 4  ;;  %v766_v55 = vrot.slane %v765_v36, 4  ;;  %v804_v6 = vadd.f32 %v803_v53, %v715_v52 }
 0x10d   :  { %v774_v12 = vadd.f32 %v773_v31, %v695_v29  ;;  %v529_v60 = vadd.f32 %v1481_v49, %v528_v7  ;;  %v699_v23 = vmax.f32 %v537_v33, 0.0  ;;  %v731_v14 = vmax.f32 %v665_v27, 0.0 }
 0x10e   :  { %v1154_v16 = vpop.f32.mrf.mxu0  ;;  %v829_v29 = vadd.f32 %v828_v30, %v730_v50  ;;  %v558_v31 = vadd.f32 %v1481_v49, %v1476_v48  ;;  %v740_v7 = vrot.slane %v1497_v28, 4  ;;  %v561_v9 = vadd.f32 %v1481_v49, %v1486_v54 }
 0x10f   :  { %v775_v19 = vadd.f32 %v774_v12, %v696_v11  ;;  %v697_v8 = vmax.f32 %v529_v60, 0.0  ;;  %v550_v56 = vadd.f32 %v1154_v16, %v1481_v49  ;;  %v817_v10 = vadd.f32 %v816_v58, %v723_v45 }
 0x110   :  { %v541_v13 = vpop.f32.mrf.mxu0  ;;  %v754_v60 = vadd.f32 %v753_v3, %v752_v38  ;;  %v830_v34 = vadd.f32 %v829_v29, %v731_v14  ;;  %v704_v15 = vmax.f32 %v558_v31, 0.0  ;;  %v767_v48 = vadd.f32 %v766_v55, %v765_v36 }
 0x111   :  { %v776_v25 = vadd.f32 %v775_v19, %v697_v8  ;;  %v542_v44 = vadd.f32 %v1481_v49, %v541_v13  ;;  %v702_v4 = vmax.f32 %v550_v56, 0.0  ;;  %v741_v16 = vadd.f32 %v740_v7, %v1497_v28 }
 0x112   :  { %v1155_v41 = vpop.f32.mrf.mxu0  ;;  %v805_v37 = vrot.slane %v804_v6, 4  ;;  %v569_v19 = vadd.f32 %v1483_v51, %v1481_v49  ;;  %v705_v8 = vmax.f32 %v561_v9, 0.0  ;;  %v818_v54 = vrot.slane %v817_v10, 4 }
 0x113   :  { %v777_v43 = vadd.f32 %v776_v25, %v698_v35  ;;  %v700_v61 = vmax.f32 %v542_v44, 0.0  ;;  %v553_v63 = vadd.f32 %v1155_v41, %v1481_v49  ;;  %v755_v33 = vrot.slane %v754_v60, 2 }
 0x114   :  { %v544_v57 = vpop.f32.mrf.mxu0  ;;  %v831_v24 = vrot.slane %v830_v34, 4  ;;  %v706_v26 = vmax.f32 %v566_v1, 0.0  ;;  %v768_v13 = vrot.slane %v767_v48, 2  ;;  %v742_v32 = vrot.slane %v741_v16, 2 }
 0x115   :  { %v545_v62 = vadd.f32 %v1481_v49, %v544_v57  ;;  %v778_v59 = vadd.f32 %v777_v43, %v699_v23  ;;  %v703_v11 = vmax.f32 %v553_v63, 0.0  ;;  %v806_v46 = vadd.f32 %v805_v37, %v804_v6 }
 0x116   :  { %v707_v25 = vmax.f32 %v569_v19, 0.0  ;;  %v819_v38 = vadd.f32 %v818_v54, %v817_v10  ;;  %v756_v28 = vadd.f32 %v755_v33, %v754_v60  ;;  %v832_v39 = vadd.f32 %v831_v24, %v830_v34  ;;  %v1061_v60 = vld [vmem:[%s1630_s4] ss:$0 sm:$0xff] }
 0x117   :  { %v701_v2 = vmax.f32 %v545_v62, 0.0  ;;  %v779_v21 = vrot.slane %v778_v59, 4  ;;  %v769_v47 = vadd.f32 %v768_v13, %v767_v48  ;;  %v743_v42 = vadd.f32 %v742_v32, %v741_v16 }
 0x118   :  { %v807_v49 = vrot.slane %v806_v46, 2  ;;  %v820_v22 = vrot.slane %v819_v38, 2  ;;  %v757_v44 = vrot.slane %v756_v28, 1  ;;  %v833_v50 = vrot.slane %v832_v39, 2 }
 0x119   :  { %v785_v5 = vadd.f32 %v701_v2, %v700_v61  ;;  %v780_v18 = vadd.f32 %v779_v21, %v778_v59  ;;  %v770_v23 = vrot.slane %v769_v47, 1  ;;  %v744_v30 = vrot.slane %v743_v42, 1 }
 0x11a   :  { %v808_v57 = vadd.f32 %v807_v49, %v806_v46  ;;  %v821_v56 = vadd.f32 %v820_v22, %v819_v38  ;;  %v758_v52 = vadd.f32 %v757_v44, %v756_v28  ;;  %v834_v53 = vadd.f32 %v833_v50, %v832_v39 }
 0x11b   :  { %v786_v12 = vadd.f32 %v785_v5, %v702_v4  ;;  %v781_v35 = vrot.slane %v780_v18, 2  ;;  %v771_v45 = vadd.f32 %v770_v23, %v769_v47  ;;  %v745_v58 = vadd.f32 %v744_v30, %v743_v42 }
 0x11c   :  { %v809_v61 = vrot.slane %v808_v57, 1  ;;  %v822_v2 = vrot.slane %v821_v56, 1  ;;  %v835_v29 = vrot.slane %v834_v53, 1 }
 0x11d   :  { %v787_v0 = vadd.f32 %v786_v12, %v703_v11  ;;  %v782_v51 = vadd.f32 %v781_v35, %v780_v18  ;;  %v846_v14 = vsel %vm845_vm3, %v758_v52, %v745_v58 }
 0x11e   :  { %v848_v31 = vsel %vm847_vm4, %v771_v45, %v846_v14  ;;  %v810_v4 = vadd.f32 %v809_v61, %v808_v57  ;;  %v823_v7 = vadd.f32 %v822_v2, %v821_v56  ;;  %v836_v21 = vadd.f32 %v835_v29, %v834_v53 }
 0x11f   :  { %v788_v20 = vadd.f32 %v787_v0, %v704_v15  ;;  %v783_v36 = vrot.slane %v782_v51, 1 }
 0x121   :  { %v789_v40 = vadd.f32 %v788_v20, %v705_v8  ;;  %v784_v63 = vadd.f32 %v783_v36, %v782_v51 }
 0x123   :  { %v790_v17 = vadd.f32 %v789_v40, %v706_v26  ;;  %v850_v5 = vsel %vm849_vm5, %v784_v63, %v848_v31 }
 0x125   :  { %v791_v41 = vadd.f32 %v790_v17, %v707_v25 }
 0x127   :  { %v792_v43 = vrot.slane %v791_v41, 4 }
 0x129   :  { %v793_v27 = vadd.f32 %v792_v43, %v791_v41 }
 0x12b   :  { %v794_v62 = vrot.slane %v793_v27, 2 }
 0x12d   :  { %v795_v59 = vadd.f32 %v794_v62, %v793_v27 }
 0x12f   :  { %v796_v3 = vrot.slane %v795_v59, 1 }
 0x131   :  { %v797_v55 = vadd.f32 %v796_v3, %v795_v59 }
 0x133   :  { %v852_v6 = vsel %vm851_vm6, %v797_v55, %v850_v5 }
 0x134   :  { %v854_v9 = vsel %vm853_vm7, %v810_v4, %v852_v6 }
 0x135   :  { %v856_v10 = vsel %vm855_vm8, %v823_v7, %v854_v9 }
 0x136   :  { %v858_v11 = vsel %vm857_vm9, %v836_v21, %v856_v10 }
 0x137   :  { %v866_v12 = vpack.c.bf16 %v858_v11, %v858_v11 }
 0x139   :  { %1201 = vmatmul.mubr.bf16.vlgmr.msra.gmra.mxu1 %v866_v12 }
 0x1f9   :  { %v972_v34 = vpop.f32.mrf.mxu1 }
 0x1fa   :  { %v973_v1 = vadd.f32 %v1061_v60, %v972_v34 }
 0x1fb   :  { %v1202_v15 = vpop.f32.mrf.mxu1 }
 0x1fc   :  { %978 = vst [vmem:[#allocation3] sm:$0xff] %v973_v1 }
 0x1fd   :  { %v975_v48 = vpop.f32.mrf.mxu1 }
 0x1fe   :  { %1269 = shalt.err (!%p1266_p4)
}
 0x1ff   :  { %988 = dma.vmem_to_hbm [thread:$0]  %s986_s28, 128, %s1631_s5, [#allocation4]   ;;  %v1203_v0 = vpop.f32.mrf.mxu1 }
 0x200   :  { %1278 = dma.done.wait [#allocation4], 128  }
 0x201   :  { %1279 = vsyncadd [#allocation4], 4294967168 }
 0x202   :  { %992 = vsyncpa [#allocation4], 1 }

</bundles_post_ra>
